<compile_context>
chip_gen: v6e
topology: v6e:2x2x1
jax: 0.10.0
libtpu: 0.0.40
codegen_flags: <defaults>
</compile_context>

<pallas_src>
import functools

import jax
import jax.numpy as jnp
from jax.experimental import pallas as pl
from jax.experimental.pallas import tpu as pltpu


_SUBLANE = 8                       # f32 sublane height
_MAX_TILE_ROWS = 512               # large batch tiles approach the HBM roofline
_VMEM_BUDGET = 48 * 1024 * 1024    # conservative across v5e/v6e/v7x


def _round_up(x, m):
    return ((x + m - 1) // m) * m


def _vmem_bytes(tile, feat_dims, d_out, x_bytes, w_bytes):
    """Rough per-step VMEM footprint (double-buffered activations/output,
    resident weights counted with 2 buffers since the pipeline default is 2)."""
    xb = sum(2 * tile * k * x_bytes for k in feat_dims)
    wb = sum(2 * k * d_out * w_bytes for k in feat_dims)
    ob = 2 * tile * d_out * 4 + 2 * d_out * 4
    return xb + wb + ob


def _batch_tiling(B, feat_dims, d_out, x_bytes, w_bytes):
    """Pick (B_pad, batch_tile): pad only to the sublane multiple, use the
    largest dividing tile <= _MAX_TILE_ROWS, prefer >=2 grid steps when the
    batch is big enough (keeps the second v7x TensorCore busy), and shrink if
    the VMEM estimate exceeds the budget."""
    B_pad = _round_up(B, _SUBLANE)
    cands = [t for t in range(_SUBLANE, min(_MAX_TILE_ROWS, B_pad) + 1, _SUBLANE)
             if B_pad % t == 0]
    tile = max(cands)
    if tile == B_pad and B_pad >= 2 * _SUBLANE:
        smaller = [t for t in cands if t <= B_pad // 2]
        if smaller:
            tile = max(smaller)
    while (_vmem_bytes(tile, feat_dims, d_out, x_bytes, w_bytes) > _VMEM_BUDGET
           and tile > _SUBLANE):
        smaller = [t for t in cands if t < tile]
        if not smaller:
            break
        tile = max(smaller)
    return B_pad, tile


def _lateral_kernel(*refs, n_branches, activated, compute_dtype):
    """out = [relu]( sum_i x_i @ W_i + b_total ), f32 accumulation on the MXU."""
    x_refs = refs[:n_branches]
    w_refs = refs[n_branches:2 * n_branches]
    b_ref = refs[2 * n_branches]
    o_ref = refs[2 * n_branches + 1]

    acc = jnp.dot(x_refs[0][...].astype(compute_dtype), w_refs[0][...],
                  preferred_element_type=jnp.float32)
    for x_ref, w_ref in zip(x_refs[1:], w_refs[1:]):
        acc = acc + jnp.dot(x_ref[...].astype(compute_dtype), w_ref[...],
                            preferred_element_type=jnp.float32)
    acc = acc + b_ref[...]            # (1, D_out) bias broadcasts over rows
    if activated:
        acc = jnp.maximum(acc, 0.0)
    o_ref[...] = acc.astype(o_ref.dtype)


def prepare_lateral_params(block_w, block_b, u_ws, u_bs,
                           compute_dtype=jnp.bfloat16):
    """One-time weight prep, hoisted out of the per-call forward path.

    Weights are cast once to the MXU compute dtype (bf16 default: 2x MXU rate
    on v6e/v7x, half the weight HBM/VMEM traffic; accumulation stays f32).
    All branch biases are pre-summed into a single (1, D_out) f32 vector.
    """
    ws = [jnp.asarray(block_w).astype(compute_dtype)]
    ws += [jnp.asarray(w).astype(compute_dtype) for w in u_ws]
    b_total = jnp.asarray(block_b, jnp.float32)
    for b in u_bs:
        b_total = b_total + jnp.asarray(b, jnp.float32)
    return {"ws": ws, "b": b_total.reshape(1, -1), "compute_dtype": compute_dtype}


def lateral_block_forward(inputs, params, activated=True):
    """Pallas implementation of LateralBlock.forward.

    inputs : list of arrays. inputs[-1] feeds the block; inputs[i] feeds the
             i-th lateral Linear (mirrors PyTorch's zip(self.u, inputs)).
    params : output of prepare_lateral_params (hoisted weight prep).
    """
    if not isinstance(inputs, (list, tuple)):
        inputs = [inputs]
    ws = params["ws"]
    b_total = params["b"]
    compute_dtype = params["compute_dtype"]
    n_lat = len(ws) - 1

    B = inputs[-1].shape[0]
    D_out = ws[0].shape[1]

    # Branch order: current column first, then laterals (zip(self.u, inputs)).
    xs = [inputs[-1].reshape(B, -1)]
    xs += [x.reshape(B, -1) for x in inputs[:n_lat]]
    xs = [x.astype(jnp.float32) for x in xs]   # activations stay f32 in HBM;
                                               # bf16 cast happens in-kernel.
    feat_dims = [x.shape[1] for x in xs]
    assert [w.shape[0] for w in ws] == feat_dims, "weight/input shape mismatch"

    x_bytes = 4
    w_bytes = jnp.dtype(compute_dtype).itemsize
    B_pad, tile_b = _batch_tiling(B, feat_dims, D_out, x_bytes, w_bytes)
    if B_pad != B:
        xs = [jnp.pad(x, ((0, B_pad - B), (0, 0))) for x in xs]

    n_branches = len(xs)
    grid = (B_pad // tile_b,)

    # Activation tiles walk the batch axis; weights/bias are resident (constant
    # block index).  Block last dims equal the full feature dims, so no K or N
    # padding is required.
    in_specs = [pl.BlockSpec((tile_b, k), lambda i: (i, 0)) for k in feat_dims]
    in_specs += [pl.BlockSpec(w.shape, lambda i: (0, 0)) for w in ws]
    in_specs += [pl.BlockSpec((1, D_out), lambda i: (0, 0))]
    out_spec = pl.BlockSpec((tile_b, D_out), lambda i: (i, 0))
    # NOTE: for large resident weights add pipeline_mode=pl.Buffered(1) to the
    # weight/bias specs to drop the redundant second VMEM buffer; at ~40 KB of
    # weights here it is irrelevant.
    # TODO(synk): if K*D_out weights ever exceed VMEM (v7x: 64 MiB physical),
    # fall back to an N-parallel / K-arbitrary tiled grid with a VMEM f32
    # accumulator instead of fully resident weights.

    kernel = functools.partial(_lateral_kernel, n_branches=n_branches,
                               activated=activated, compute_dtype=compute_dtype)

    k_total = sum(feat_dims)
    cost = pl.CostEstimate(
        flops=2 * B_pad * k_total * D_out,
        transcendentals=0,
        bytes_accessed=(B_pad * k_total * x_bytes
                        + k_total * D_out * w_bytes
                        + D_out * 4
                        + B_pad * D_out * 4),
    )

    compiler_kwargs = dict(dimension_semantics=("parallel",))
    vmem_est = _vmem_bytes(tile_b, feat_dims, D_out, x_bytes, w_bytes)
    if vmem_est > 16 * 1024 * 1024:   # above the most conservative scoped default
        compiler_kwargs["vmem_limit_bytes"] = min(100 * 1024 * 1024,
                                                  int(vmem_est * 1.5))

    out = pl.pallas_call(
        kernel,
        out_shape=jax.ShapeDtypeStruct((B_pad, D_out), jnp.float32),
        grid=grid,
        in_specs=in_specs,
        out_specs=out_spec,
        compiler_params=pltpu.CompilerParams(**compiler_kwargs),
        cost_estimate=cost,
    )(*xs, *ws, b_total)

    out = out if B_pad == B else out[:B]
    # If self.out_shape were a tuple, the caller would reshape to (B, *out_shape).
    return out


def _reference(inputs, block_w, block_b, u_ws, u_bs, activated=True,
               cast_dtype=jnp.float32):
    """Pure-JAX LateralBlock reference (optionally with the kernel's bf16 cast)."""
    B = inputs[-1].shape[0]

    def lin(x, w, b):
        xf = x.reshape(B, -1).astype(cast_dtype).astype(jnp.float32)
        wf = w.astype(cast_dtype).astype(jnp.float32)
        return xf @ wf + b

    res = lin(inputs[-1], block_w, block_b)
    for x, w, b in zip(inputs[:len(u_ws)], u_ws, u_bs):
        res = res + lin(x, w, b)
    return jnp.maximum(res, 0.0) if activated else res


if __name__ == "__main__":
    key = jax.random.PRNGKey(0)
    ks = jax.random.split(key, 9)

    B = 2
    D_out = 32       # out_shape (scalar) of this column/depth
    D_cur = 32       # feature size fed to the current column's block

    # Previous-column activations (laterals); in_shapes = [(4, 8, 8), 48].
    x0 = jax.random.normal(ks[0], (B, 4, 8, 8), jnp.float32)   # NCHW
    x1 = jax.random.normal(ks[1], (B, 48), jnp.float32)
    # Current column input (fed to self.block).
    x2 = jax.random.normal(ks[2], (B, D_cur), jnp.float32)
    inputs = [x0, x1, x2]

    # Deterministic synthetic parameters (no checkpoint).
    block_w = 0.05 * jax.random.normal(ks[3], (D_cur, D_out), jnp.float32)
    block_b = 0.05 * jax.random.normal(ks[4], (D_out,), jnp.float32)
    u_ws = [
        0.05 * jax.random.normal(ks[5], (4 * 8 * 8, D_out), jnp.float32),
        0.05 * jax.random.normal(ks[6], (48, D_out), jnp.float32),
    ]
    u_bs = [
        0.05 * jax.random.normal(ks[7], (D_out,), jnp.float32),
        0.05 * jax.random.normal(ks[8], (D_out,), jnp.float32),
    ]

    # One-time (hoisted) weight prep, then the per-call forward.
    params = prepare_lateral_params(block_w, block_b, u_ws, u_bs)
    out = lateral_block_forward(inputs, params, activated=True)
    out = jax.block_until_ready(out)
    assert out.shape == (B, D_out)

    # Check 1: same bf16 cast of x/w as the kernel, f32 accumulation -> tight.
    ref_bf16 = _reference(inputs, block_w, block_b, u_ws, u_bs,
                          activated=True, cast_dtype=jnp.bfloat16)
    assert jnp.allclose(out, ref_bf16, atol=1e-3, rtol=1e-3), "mismatch vs bf16 ref"

    # Check 2: original-module f32 semantics (bf16 rounding tolerance).
    ref_f32 = _reference(inputs, block_w, block_b, u_ws, u_bs,
                         activated=True, cast_dtype=jnp.float32)
    assert jnp.allclose(out, ref_f32, atol=3e-2, rtol=3e-2), "mismatch vs f32 ref"

    print("KERNEL_OK")
</pallas_src>

<mosaic_0001>
module attributes {stable_mosaic.version = 11 : i64} {
  func.func @_lateral_kernel(%arg0: i32, %arg1: memref<8x32xf32, #tpu.memory_space<vmem>>, %arg2: memref<8x256xf32, #tpu.memory_space<vmem>>, %arg3: memref<8x48xf32, #tpu.memory_space<vmem>>, %arg4: memref<32x32xbf16, #tpu.memory_space<vmem>>, %arg5: memref<256x32xbf16, #tpu.memory_space<vmem>>, %arg6: memref<48x32xbf16, #tpu.memory_space<vmem>>, %arg7: memref<1x32xf32, #tpu.memory_space<vmem>>, %arg8: memref<8x32xf32, #tpu.memory_space<vmem>>) attributes {dimension_semantics = [#tpu.dimension_semantics<parallel>], iteration_bounds = array<i64: 1>, scalar_prefetch = 0 : i64, scratch_operands = 0 : i64, tpu.core_type = #tpu.core_type<tc>, window_params = [{transform_indices = @transform_0, window_bounds = array<i64: 8, 32>}, {transform_indices = @transform_1, window_bounds = array<i64: 8, 256>}, {transform_indices = @transform_2, window_bounds = array<i64: 8, 48>}, {pipeline_mode = #tpu.pipeline_mode<synchronous>, transform_indices = @transform_3, window_bounds = array<i64: 32, 32>}, {pipeline_mode = #tpu.pipeline_mode<synchronous>, transform_indices = @transform_4, window_bounds = array<i64: 256, 32>}, {pipeline_mode = #tpu.pipeline_mode<synchronous>, transform_indices = @transform_5, window_bounds = array<i64: 48, 32>}, {pipeline_mode = #tpu.pipeline_mode<synchronous>, transform_indices = @transform_6, window_bounds = array<i64: 1, 32>}, {transform_indices = @transform_7, window_bounds = array<i64: 8, 32>}]} {
    %c0 = arith.constant 0 : index
    %c0_0 = arith.constant 0 : index
    %0 = vector.load %arg1[%c0, %c0_0] : memref<8x32xf32, #tpu.memory_space<vmem>>, vector<8x32xf32>
    %1 = arith.truncf %0 : vector<8x32xf32> to vector<8x32xbf16>
    %c0_1 = arith.constant 0 : index
    %c0_2 = arith.constant 0 : index
    %2 = vector.load %arg4[%c0_1, %c0_2] : memref<32x32xbf16, #tpu.memory_space<vmem>>, vector<32x32xbf16>
    %cst = arith.constant dense<0.000000e+00> : vector<8x32xf32>
    %3 = tpu.matmul %1, %2, %cst {dimension_numbers = #tpu.dot_dimension_numbers<[1], [0], [0], [1], [0, 0, 1, 1], [], []>} : vector<8x32xbf16>, vector<32x32xbf16>, vector<8x32xf32> -> vector<8x32xf32>
    %c0_3 = arith.constant 0 : index
    %c0_4 = arith.constant 0 : index
    %4 = vector.load %arg2[%c0_3, %c0_4] : memref<8x256xf32, #tpu.memory_space<vmem>>, vector<8x256xf32>
    %5 = arith.truncf %4 : vector<8x256xf32> to vector<8x256xbf16>
    %c0_5 = arith.constant 0 : index
    %c0_6 = arith.constant 0 : index
    %6 = vector.load %arg5[%c0_5, %c0_6] : memref<256x32xbf16, #tpu.memory_space<vmem>>, vector<256x32xbf16>
    %cst_7 = arith.constant dense<0.000000e+00> : vector<8x32xf32>
    %7 = tpu.matmul %5, %6, %cst_7 {dimension_numbers = #tpu.dot_dimension_numbers<[1], [0], [0], [1], [0, 0, 1, 1], [], []>} : vector<8x256xbf16>, vector<256x32xbf16>, vector<8x32xf32> -> vector<8x32xf32>
    %8 = arith.addf %3, %7 : vector<8x32xf32>
    %c0_8 = arith.constant 0 : index
    %c0_9 = arith.constant 0 : index
    %9 = vector.load %arg3[%c0_8, %c0_9] : memref<8x48xf32, #tpu.memory_space<vmem>>, vector<8x48xf32>
    %10 = arith.truncf %9 : vector<8x48xf32> to vector<8x48xbf16>
    %c0_10 = arith.constant 0 : index
    %c0_11 = arith.constant 0 : index
    %11 = vector.load %arg6[%c0_10, %c0_11] : memref<48x32xbf16, #tpu.memory_space<vmem>>, vector<48x32xbf16>
    %cst_12 = arith.constant dense<0.000000e+00> : vector<8x32xf32>
    %12 = tpu.matmul %10, %11, %cst_12 {dimension_numbers = #tpu.dot_dimension_numbers<[1], [0], [0], [1], [0, 0, 1, 1], [], []>} : vector<8x48xbf16>, vector<48x32xbf16>, vector<8x32xf32> -> vector<8x32xf32>
    %13 = arith.addf %8, %12 : vector<8x32xf32>
    %c0_13 = arith.constant 0 : index
    %c0_14 = arith.constant 0 : index
    %14 = vector.load %arg7[%c0_13, %c0_14] : memref<1x32xf32, #tpu.memory_space<vmem>>, vector<1x32xf32>
    %15 = vector.broadcast %14 : vector<1x32xf32> to vector<8x32xf32>
    %16 = arith.addf %13, %15 : vector<8x32xf32>
    %cst_15 = arith.constant 0.000000e+00 : f32
    %17 = vector.broadcast %cst_15 : f32 to vector<8x32xf32>
    %18 = arith.maximumf %16, %17 : vector<8x32xf32>
    %c0_16 = arith.constant 0 : index
    %c0_17 = arith.constant 0 : index
    %19 = vector.load %arg8[%c0_16, %c0_17] : memref<8x32xf32, #tpu.memory_space<vmem>>, vector<8x32xf32>
    tpu.vector_store %arg8[%c0_16, %c0_17], %18 {strides = array<i32>} : memref<8x32xf32, #tpu.memory_space<vmem>>, vector<8x32xf32>,
    return
  }
  func.func @transform_0(%arg0: i32) -> (i32, i32) {
    %c0_i32 = arith.constant 0 : i32
    %c0_i32_0 = arith.constant 0 : i32
    return %arg0, %c0_i32 : i32, i32
  }
  func.func @transform_1(%arg0: i32) -> (i32, i32) {
    %c0_i32 = arith.constant 0 : i32
    %c0_i32_0 = arith.constant 0 : i32
    return %arg0, %c0_i32 : i32, i32
  }
  func.func @transform_2(%arg0: i32) -> (i32, i32) {
    %c0_i32 = arith.constant 0 : i32
    %c0_i32_0 = arith.constant 0 : i32
    return %arg0, %c0_i32 : i32, i32
  }
  func.func @transform_3(%arg0: i32) -> (i32, i32) {
    %c0_i32 = arith.constant 0 : i32
    %c0_i32_0 = arith.constant 0 : i32
    %c0_i32_1 = arith.constant 0 : i32
    return %c0_i32, %c0_i32_0 : i32, i32
  }
  func.func @transform_4(%arg0: i32) -> (i32, i32) {
    %c0_i32 = arith.constant 0 : i32
    %c0_i32_0 = arith.constant 0 : i32
    %c0_i32_1 = arith.constant 0 : i32
    return %c0_i32, %c0_i32_0 : i32, i32
  }
  func.func @transform_5(%arg0: i32) -> (i32, i32) {
    %c0_i32 = arith.constant 0 : i32
    %c0_i32_0 = arith.constant 0 : i32
    %c0_i32_1 = arith.constant 0 : i32
    return %c0_i32, %c0_i32_0 : i32, i32
  }
  func.func @transform_6(%arg0: i32) -> (i32, i32) {
    %c0_i32 = arith.constant 0 : i32
    %c0_i32_0 = arith.constant 0 : i32
    %c0_i32_1 = arith.constant 0 : i32
    return %c0_i32, %c0_i32_0 : i32, i32
  }
  func.func @transform_7(%arg0: i32) -> (i32, i32) {
    %c0_i32 = arith.constant 0 : i32
    %c0_i32_0 = arith.constant 0 : i32
    return %arg0, %c0_i32 : i32, i32
  }
}

</mosaic_0001>

<bundles_post_ra>
// kernel: tpu_custom_call.1
= control target key start
LH: loop header
LB: loop body
LE: loop exit
PB: predicated region body
PF: predicated region fallthrough
CT: control target
= control target key end

     0   :  { %v474_v2 = vmov 0.0   ;;  %vm475_vm0 = vmmov 0   ;;  %vm218_vm1 = vcmask 261120   ;;  %s602_s0 = inlined_call_operand.vmem [shape: f32[8,32], index: 0, kind: input, shape index: {}]   ;;  %s603_s1 = inlined_call_operand.vmem [shape: f32[8,256], index: 1, kind: input, shape index: {}]   ;;  %s604_s2 = inlined_call_operand.vmem [shape: f32[8,48], index: 2, kind: input, shape index: {}]   ;;  %s605_s3 = inlined_call_operand.vmem [shape: bf16[32,32], index: 3, kind: input, shape index: {}]   ;;  %s606_s4 = inlined_call_operand.vmem [shape: bf16[256,32], index: 4, kind: input, shape index: {}]   ;;  %s607_s5 = inlined_call_operand.vmem [shape: bf16[48,32], index: 5, kind: input, shape index: {}]   ;;  %s608_s6 = inlined_call_operand.vmem [shape: f32[1,32], index: 6, kind: input, shape index: {}]   ;;  %s609_s7 = inlined_call_operand.hbm [shape: f32[8,32], index: 7, kind: output, shape index: {}]  }
   0x1   :  { %v431_v0 = vld [vmem:[%s606_s4 + $0x78] sm:$0xff]   ;;  %410 = vmatprep.subr.bf16.mxu1 %v474_v2  ;;  %v433_v3 = vld [vmem:[%s606_s4 + $0x70] sm:$0xff]   ;;  %414 = vmatprep.mubr.msk.bf16.mxu1 %vm475_vm0, %v474_v2  ;;  %v435_v5 = vld [vmem:[%s606_s4 + $0x68] sm:$0xff]  }
   0x2   :  { %v432_v1 = vld [vmem:[%s606_s4 + $0x38] sm:$0xff]   ;;  %381 = vmatprep.subr.bf16.mxu0 %v431_v0  ;;  %v434_v4 = vld [vmem:[%s606_s4 + $0x30] sm:$0xff]   ;;  %v436_v6 = vld [vmem:[%s606_s4 + $0x28] sm:$0xff]  }
   0x3   :  { %382 = vmatpush3.bf16.msra.mxu0 %v432_v1  ;;  %v437_v7 = vld [vmem:[%s606_s4 + $0x60] sm:$0xff]   ;;  %v439_v8 = vld [vmem:[%s605_s3 + $0x8] sm:$0xff]   ;;  %v440_v11 = vld [vmem:[%s606_s4 + $0x58] sm:$0xff]  }
   0x4   :  { %383 = vmatprep.subr.bf16.mxu0 %v433_v3  ;;  %v438_v9 = vld [vmem:[%s606_s4 + $0x20] sm:$0xff]   ;;  %411 = vmatpush3.bf16.msra.mxu1 %v439_v8  ;;  %v441_v12 = vld [vmem:[%s606_s4 + $0x18] sm:$0xff]   ;;  %v445_v15 = vld [vmem:[%s607_s5 + $0x10] sm:$0xff]  }
   0x5   :  { %412 = vmatprep.subr.bf16.mxu1 %v474_v2  ;;  %v442_v10 = vld [vmem:[%s605_s3] sm:$0xff]   ;;  %v443_v16 = vld [vmem:[%s606_s4 + $0x50] sm:$0xff]   ;;  %v448_v17 = vld [vmem:[%s607_s5 + $0x8] sm:$0xff]  }
   0x6   :  { %v28_v13 = vld [vmem:[%s602_s0] sm:$0xff]  ;;  %v444_v18 = vld [vmem:[%s606_s4 + $0x10] sm:$0xff]   ;;  %v446_v19 = vld [vmem:[%s606_s4 + $0x48] sm:$0xff]  }
   0x7   :  { %384 = vmatpush3.bf16.msra.mxu0 %v434_v4  ;;  %v29_v14 = vpack.c.bf16 %v28_v13, %v28_v13  ;;  %v35_v20 = vld [vmem:[%s603_s1 + $0x8] sm:$0xff]  ;;  %v451_v21 = vld [vmem:[%s607_s5] sm:$0xff]  }
   0x8   :  { %385 = vmatprep.subr.bf16.mxu0 %v435_v5  ;;  %413 = vmatpush3.bf16.msra.mxu1 %v442_v10  ;;  %v37_v22 = vpack.c.bf16 %v35_v20, %v35_v20  ;;  %v262_v23 = vld [vmem:[%s604_s2] sm:$0xff] }
   0x9   :  { %418 = vmatprep.subr.bf16.mxu1 %v474_v2 }
   0xb   :  { %386 = vmatpush3.bf16.msra.mxu0 %v436_v6  ;;  %415 = vmatmul.mubr.msk.bf16.vlgmr.msra.gmra.mxu1 %vm218_vm1, %v29_v14 }
   0xc   :  { %387 = vmatprep.subr.bf16.mxu0 %v437_v7  ;;  %419 = vmatpush3.bf16.msra.mxu1 %v445_v15 }
   0xd   :  { %424 = vmatprep.mubr.msk.bf16.mxu1 %vm475_vm0, %v474_v2  ;;  %420 = vmatprep.subr.bf16.mxu1 %v474_v2 }
   0xf   :  { %388 = vmatpush3.bf16.msra.mxu0 %v438_v9 }
  0x10   :  { %389 = vmatprep.subr.bf16.mxu0 %v440_v11  ;;  %421 = vmatpush3.bf16.msra.mxu1 %v448_v17 }
  0x13   :  { %390 = vmatpush3.bf16.msra.mxu0 %v441_v12 }
  0x14   :  { %391 = vmatprep.subr.bf16.mxu0 %v443_v16 }
  0x15   :  { %12 = vsyncpa [#allocation3], 0  ;;  %v447_v24 = vld [vmem:[%s606_s4 + $0x8] sm:$0xff]   ;;  %422 = vmatprep.subr.bf16.mxu1 %v474_v2  ;;  %v449_v25 = vld [vmem:[%s606_s4 + $0x40] sm:$0xff]   ;;  %198 = vmatprep.mubr.bf16.mxu0 %v37_v22  ;;  %v263_v26 = vpack.c.bf16 %v262_v23, %v262_v23  ;;  %vm288_vm2 = vcmask 392192   ;;  %s476_s24 = smov [#allocation2]  }
  0x16   :  { %423 = vmatpush3.bf16.msra.mxu1 %v451_v21  ;;  %v450_v27 = vld [vmem:[%s606_s4] sm:$0xff]   ;;  %s349_s25 = sshll.u32 %s476_s24, 4  ;;  %s350_s25 = int_to_ptr.vmem [resolvable:$true] %s349_s25 }
  0x17   :  { %392 = vmatpush3.bf16.msra.mxu0 %v444_v18  ;;  %v34_v28 = vld [vmem:[%s603_s1] sm:$0xff]  ;;  %s452_s26 = scalar_lea.vmem %s350_s25, 128  ;;  %p457_p1 = scmp.lt.s32.totalorder %s350_s25, %s350_s25 }
  0x18   :  { %393 = vmatprep.subr.bf16.mxu0 %v446_v19  ;;  %v36_v29 = vpack.c.bf16 %v34_v28, %v34_v28  ;;  %v380_v44 = vld [vmem:[%s608_s6] ss:$0 sm:$0xff]  ;;  %p453_p0 = scmp.ne.s32.totalorder %s350_s25, %s452_s26  ;;  %p458_p2 = scmp.lt.s32.totalorder %s452_s26, %s452_s26 }
  0x19   :  { %425 = vmatmul.mubr.msk.bf16.vlgmr.msra.gmra.mxu1 %vm288_vm2, %v263_v26 }
  0x1a   :  { %p459_p3 = por %p458_p2, %p457_p1 }
  0x1b   :  { %394 = vmatpush3.bf16.msra.mxu0 %v447_v24 }
  0x1c   :  { %395 = vmatprep.subr.bf16.mxu0 %v449_v25  ;;  %p460_p4 = pnand %p459_p3, %p453_p0 }
  0x1f   :  { %396 = vmatpush3.bf16.msra.mxu0 %v450_v27 }
  0x22   :  { %199 = vmatmul.mubr.bf16.vlgmr.msra.gmra.mxu0 %v36_v29 }
  0xcb   :  { %v256_v30 = vpop.f32.mrf.mxu1 }
  0xcd   :  { %v416_v31 = vpop.f32.mrf.mxu1 }
  0xcf   :  { %v259_v32 = vpop.f32.mrf.mxu1 }
  0xd1   :  { %v417_v33 = vpop.f32.mrf.mxu1 }
  0xd9   :  { %v326_v34 = vpop.f32.mrf.mxu1 }
  0xdb   :  { %v426_v35 = vpop.f32.mrf.mxu1 }
  0xdd   :  { %v329_v36 = vpop.f32.mrf.mxu1 }
  0xdf   :  { %v427_v38 = vpop.f32.mrf.mxu1 }
  0xe2   :  { %v397_v37 = vpop.f32.mrf.mxu0 }
  0xe4   :  { %v398_v39 = vpop.f32.mrf.mxu0 }
  0xe5   :  { %v399_v40 = vadd.f32 %v398_v39, %v397_v37 }
  0xe6   :  { %v400_v41 = vpop.f32.mrf.mxu0 }
  0xe7   :  { %v257_v42 = vadd.f32 %v399_v40, %v256_v30 }
  0xe8   :  { %v401_v43 = vpop.f32.mrf.mxu0 }
  0xe9   :  { %v332_v45 = vadd.f32 %v326_v34, %v257_v42 }
  0xeb   :  { %v340_v46 = vadd.f32 %v380_v44, %v332_v45 }
  0xed   :  { %v341_v47 = vmax.f32 %v340_v46, 0.0 }
  0xef   :  { %342 = vst.msk [vmem:[#allocation2] sm:$0xff] %vm218_vm1, %v341_v47 }
  0xf0   :  { %463 = shalt.err (!%p460_p4)
}
  0xf1   :  { %352 = dma.vmem_to_hbm [thread:$0]  %s350_s25, 128, %s609_s7, [#allocation3]  }
  0xf2   :  { %472 = dma.done.wait [#allocation3], 128  }
  0xf3   :  { %473 = vsyncadd [#allocation3], 4294967168 }
  0xf4   :  { %356 = vsyncpa [#allocation3], 1 }

</bundles_post_ra>
